<compile_context>
chip_gen: v7x
topology: tpu7x:2x2x1
jax: 0.10.0
libtpu: 0.0.40
codegen_flags: <defaults>
</compile_context>

<pallas_src>
import functools

import jax
import jax.numpy as jnp
from jax import lax
from jax.experimental import pallas as pl
from jax.experimental.pallas import tpu as pltpu


def _partial_bsconvu_kernel(xp_ref, w3_ref, pwt_ref, bout_ref, out_ref, *,
                            H, W, RC, OC, COUT, K, PADF):
    # xp_ref  : (C, HW + 2*PADF)  flat, spatially zero-padded input (1 batch elem)
    # w3_ref  : (RC, K*K)         depthwise weights, tap-major (kh*K + kw)
    # pwt_ref : (COUT, C)         pointwise 1x1 weights (out_ch, in_ch)
    # bout_ref: (COUT, 1)         pw[:, :RC] @ dw_bias  (folded constant)
    # out_ref : (COUT, HW)
    HW = H * W
    pad = K // 2

    # Column index of every flattened spatial position, for horizontal boundary
    # masks.  Vertical out-of-bounds taps fall into the flat zero padding, so
    # only column masks are required.
    col = lax.broadcasted_iota(jnp.int32, (RC, HW), 1) % W

    # Depthwise KxK conv (cross-correlation) as K*K shifted taps on the VPU.
    acc = jnp.zeros((RC, HW), jnp.float32)
    for kh in range(K):
        for kw in range(K):
            dh = kh - pad
            dw = kw - pad
            off = dh * W + dw
            tap = xp_ref[:RC, PADF + off:PADF + off + HW].astype(jnp.float32)
            if dw < 0:
                tap = jnp.where(col >= -dw, tap, 0.0)
            elif dw > 0:
                tap = jnp.where(col <= (W - 1 - dw), tap, 0.0)
            w_tap = w3_ref[:, kh * K + kw:kh * K + kw + 1]     # (RC, 1)
            acc = acc + w_tap * tap

    x2 = xp_ref[RC:, PADF:PADF + HW].astype(jnp.float32)       # (OC, HW)
    pwt = pwt_ref[...]                                         # (COUT, C)

    # Pointwise 1x1 conv: out[o, p] = sum_c pwt[o, c] * y[c, p], y = [acc ; x2],
    # computed as C broadcast FMAs — no concat, no MXU, lane-dense output.
    out = jnp.broadcast_to(bout_ref[...], (COUT, HW)).astype(jnp.float32)
    for c in range(RC):
        out = out + pwt[:, c:c + 1] * jnp.broadcast_to(acc[c:c + 1, :],
                                                       (COUT, HW))
    for c in range(OC):
        out = out + pwt[:, RC + c:RC + c + 1] * jnp.broadcast_to(
            x2[c:c + 1, :], (COUT, HW))

    out_ref[...] = out.astype(out_ref.dtype)


def partial_bsconvu(x_nchw, dw_w, dw_b, pw_w, *, kernel_size=3):
    """PartialBSConvU forward (stride=1, padding=K//2, dilation=1).

    x_nchw: (N, C, H, W) float32
    dw_w  : (rc, K, K)   depthwise weight (PyTorch (rc, 1, K, K) squeezed)
    dw_b  : (rc,)        depthwise bias
    pw_w  : (cout, C)    pointwise 1x1 weight (PyTorch (cout, C, 1, 1) squeezed)
    returns (N, cout, H, W)
    """
    N, C, H, W = x_nchw.shape
    rc = dw_w.shape[0]
    oc = C - rc
    cout = pw_w.shape[0]
    K = kernel_size
    HW = H * W
    PADF = (K // 2) * (W + 1)        # covers the largest flat tap offset

    # (N,C,H,W) -> (N,C,H*W) is free in row-major NCHW; one small flat pad
    # replaces the 2-D 'same' padding.
    xp = jnp.pad(x_nchw.reshape(N, C, HW), ((0, 0), (0, 0), (PADF, PADF)))

    w3 = dw_w.reshape(rc, K * K)
    pwt = pw_w.reshape(cout, C)
    bout = (pwt[:, :rc] @ dw_b).reshape(cout, 1)   # folded depthwise bias

    kernel = functools.partial(_partial_bsconvu_kernel, H=H, W=W, RC=rc, OC=oc,
                               COUT=cout, K=K, PADF=PADF)

    out_flat = pl.pallas_call(
        kernel,
        out_shape=jax.ShapeDtypeStruct((N, cout, HW), x_nchw.dtype),
        grid_spec=pltpu.PrefetchScalarGridSpec(
            num_scalar_prefetch=0,
            grid=(N,),
            in_specs=[
                pl.BlockSpec((None, C, HW + 2 * PADF), lambda n: (n, 0, 0)),
                pl.BlockSpec((rc, K * K), lambda n: (0, 0)),
                pl.BlockSpec((cout, C), lambda n: (0, 0)),
                pl.BlockSpec((cout, 1), lambda n: (0, 0)),
            ],
            out_specs=pl.BlockSpec((None, cout, HW), lambda n: (n, 0, 0)),
        ),
        compiler_params=pltpu.CompilerParams(
            dimension_semantics=("parallel",)),
    )(xp, w3, pwt, bout)

    return out_flat.reshape(N, cout, H, W)


def reference(x, dw_w, dw_b, pw_w, *, kernel_size=3):
    """Pure-JAX reference using lax.conv in NCHW."""
    N, C, H, W = x.shape
    rc = dw_w.shape[0]
    cout = pw_w.shape[0]
    K = kernel_size
    x1, x2 = x[:, :rc], x[:, rc:]
    dn = ('NCHW', 'OIHW', 'NCHW')
    y1 = lax.conv_general_dilated(x1, dw_w.reshape(rc, 1, K, K), (1, 1), 'SAME',
                                  dimension_numbers=dn, feature_group_count=rc)
    y1 = y1 + dw_b.reshape(1, rc, 1, 1)
    y = jnp.concatenate([y1, x2], axis=1)
    out = lax.conv_general_dilated(y, pw_w.reshape(cout, C, 1, 1), (1, 1),
                                   'VALID', dimension_numbers=dn)
    return out


if __name__ == "__main__":
    # Module config: in_channels=8, out_channels=8, kernel_size=3, stride=1,
    # padding=1, bias=True, scale=2  ->  rc = 4, oc = 4.
    N, C, H, W = 2, 8, 16, 16
    COUT = 8
    K = 3
    rc = C // 2
    oc = C - rc

    key = jax.random.PRNGKey(0)
    k_x, k_w3, k_b3, k_pw = jax.random.split(key, 4)

    x = jax.random.normal(k_x, (N, C, H, W), dtype=jnp.float32)
    dw_w = 0.1 * jax.random.normal(k_w3, (rc, K, K), dtype=jnp.float32)   # dw 3x3
    dw_b = 0.1 * jax.random.normal(k_b3, (rc,), dtype=jnp.float32)        # dw bias
    pw_w = 0.1 * jax.random.normal(k_pw, (COUT, C), dtype=jnp.float32)    # 1x1, no bias

    out = partial_bsconvu(x, dw_w, dw_b, pw_w, kernel_size=K)
    out = jax.block_until_ready(out)

    ref = reference(x, dw_w, dw_b, pw_w, kernel_size=K)
    assert out.shape == (N, COUT, H, W), out.shape
    err = float(jnp.max(jnp.abs(out - ref)))
    assert jnp.allclose(out, ref, atol=1e-4, rtol=1e-4), err

    print("KERNEL_OK")
</pallas_src>

<mosaic_0001>
module attributes {stable_mosaic.version = 11 : i64} {
  func.func @_partial_bsconvu_kernel(%arg0: i32, %arg1: memref<1x8x290xf32, #tpu.memory_space<vmem>>, %arg2: memref<4x9xf32, #tpu.memory_space<vmem>>, %arg3: memref<8x8xf32, #tpu.memory_space<vmem>>, %arg4: memref<8x1xf32, #tpu.memory_space<vmem>>, %arg5: memref<1x8x256xf32, #tpu.memory_space<vmem>>) attributes {dimension_semantics = [#tpu.dimension_semantics<parallel>], iteration_bounds = array<i64: 2>, scalar_prefetch = 0 : i64, scratch_operands = 0 : i64, tpu.core_type = #tpu.core_type<tc>, window_params = [{transform_indices = @transform_0, window_bounds = array<i64: 1, 8, 290>}, {pipeline_mode = #tpu.pipeline_mode<synchronous>, transform_indices = @transform_1, window_bounds = array<i64: 4, 9>}, {pipeline_mode = #tpu.pipeline_mode<synchronous>, transform_indices = @transform_2, window_bounds = array<i64: 8, 8>}, {pipeline_mode = #tpu.pipeline_mode<synchronous>, transform_indices = @transform_3, window_bounds = array<i64: 8, 1>}, {transform_indices = @transform_4, window_bounds = array<i64: 1, 8, 256>}]} {
    %0 = tpu.iota {dimensions = array<i32: 1>} : vector<4x256xi32>
    %c16_i32 = arith.constant 16 : i32
    %c0_i32 = arith.constant 0 : i32
    %1 = arith.cmpi eq, %c16_i32, %c0_i32 : i32
    %c1_i32 = arith.constant 1 : i32
    %2 = arith.select %1, %c1_i32, %c16_i32 : i32
    %3 = vector.broadcast %2 : i32 to vector<4x256xi32>
    %4 = arith.remsi %0, %3 : vector<4x256xi32>
    %c0_i32_0 = arith.constant 0 : i32
    %5 = vector.broadcast %c0_i32_0 : i32 to vector<4x256xi32>
    %6 = arith.cmpi ne, %4, %5 : vector<4x256xi32>
    %c0_i32_1 = arith.constant 0 : i32
    %7 = vector.broadcast %c0_i32_1 : i32 to vector<4x256xi32>
    %8 = arith.cmpi slt, %4, %7 : vector<4x256xi32>
    %c0_i32_2 = arith.constant 0 : i32
    %9 = arith.cmpi slt, %2, %c0_i32_2 : i32
    %10 = vector.broadcast %9 : i1 to vector<4x256xi1>
    %11 = vector.broadcast %10 : vector<4x256xi1> to vector<4x256xi1>
    %12 = arith.xori %8, %11 : vector<4x256xi1>
    %13 = arith.andi %12, %6 : vector<4x256xi1>
    %14 = vector.broadcast %2 : i32 to vector<4x256xi32>
    %15 = arith.addi %4, %14 : vector<4x256xi32>
    %16 = arith.select %13, %15, %4 : vector<4x256xi1>, vector<4x256xi32>
    %cst = arith.constant 0.000000e+00 : f32
    %17 = vector.broadcast %cst : f32 to vector<4x256xf32>
    %c0 = arith.constant 0 : index
    %c0_3 = arith.constant 0 : index
    %c0_4 = arith.constant 0 : index
    %18 = vector.load %arg1[%c0, %c0_3, %c0_4] : memref<1x8x290xf32, #tpu.memory_space<vmem>>, vector<1x4x256xf32>
    %19 = vector.shape_cast %18 : vector<1x4x256xf32> to vector<4x256xf32>
    %c1_i32_5 = arith.constant 1 : i32
    %20 = vector.broadcast %c1_i32_5 : i32 to vector<4x256xi32>
    %21 = arith.cmpi sge, %16, %20 : vector<4x256xi32>
    %cst_6 = arith.constant 0.000000e+00 : f32
    %22 = vector.broadcast %cst_6 : f32 to vector<4x256xf32>
    %23 = arith.select %21, %19, %22 : vector<4x256xi1>, vector<4x256xf32>
    %c0_7 = arith.constant 0 : index
    %c0_8 = arith.constant 0 : index
    %24 = vector.load %arg2[%c0_7, %c0_8] : memref<4x9xf32, #tpu.memory_space<vmem>>, vector<4x1xf32>
    %25 = vector.broadcast %24 : vector<4x1xf32> to vector<4x256xf32>
    %26 = arith.mulf %25, %23 : vector<4x256xf32>
    %27 = arith.addf %17, %26 : vector<4x256xf32>
    %c0_9 = arith.constant 0 : index
    %c0_10 = arith.constant 0 : index
    %c1 = arith.constant 1 : index
    %28 = vector.load %arg1[%c0_9, %c0_10, %c1] : memref<1x8x290xf32, #tpu.memory_space<vmem>>, vector<1x4x256xf32>
    %29 = vector.shape_cast %28 : vector<1x4x256xf32> to vector<4x256xf32>
    %c0_11 = arith.constant 0 : index
    %c1_12 = arith.constant 1 : index
    %30 = vector.load %arg2[%c0_11, %c1_12] : memref<4x9xf32, #tpu.memory_space<vmem>>, vector<4x1xf32>
    %31 = vector.broadcast %30 : vector<4x1xf32> to vector<4x256xf32>
    %32 = arith.mulf %31, %29 : vector<4x256xf32>
    %33 = arith.addf %27, %32 : vector<4x256xf32>
    %c0_13 = arith.constant 0 : index
    %c0_14 = arith.constant 0 : index
    %c2 = arith.constant 2 : index
    %34 = vector.load %arg1[%c0_13, %c0_14, %c2] : memref<1x8x290xf32, #tpu.memory_space<vmem>>, vector<1x4x256xf32>
    %35 = vector.shape_cast %34 : vector<1x4x256xf32> to vector<4x256xf32>
    %c14_i32 = arith.constant 14 : i32
    %36 = vector.broadcast %c14_i32 : i32 to vector<4x256xi32>
    %37 = arith.cmpi sle, %16, %36 : vector<4x256xi32>
    %cst_15 = arith.constant 0.000000e+00 : f32
    %38 = vector.broadcast %cst_15 : f32 to vector<4x256xf32>
    %39 = arith.select %37, %35, %38 : vector<4x256xi1>, vector<4x256xf32>
    %c0_16 = arith.constant 0 : index
    %c2_17 = arith.constant 2 : index
    %40 = vector.load %arg2[%c0_16, %c2_17] : memref<4x9xf32, #tpu.memory_space<vmem>>, vector<4x1xf32>
    %41 = vector.broadcast %40 : vector<4x1xf32> to vector<4x256xf32>
    %42 = arith.mulf %41, %39 : vector<4x256xf32>
    %43 = arith.addf %33, %42 : vector<4x256xf32>
    %c0_18 = arith.constant 0 : index
    %c0_19 = arith.constant 0 : index
    %c16 = arith.constant 16 : index
    %44 = vector.load %arg1[%c0_18, %c0_19, %c16] : memref<1x8x290xf32, #tpu.memory_space<vmem>>, vector<1x4x256xf32>
    %45 = vector.shape_cast %44 : vector<1x4x256xf32> to vector<4x256xf32>
    %c1_i32_20 = arith.constant 1 : i32
    %46 = vector.broadcast %c1_i32_20 : i32 to vector<4x256xi32>
    %47 = arith.cmpi sge, %16, %46 : vector<4x256xi32>
    %cst_21 = arith.constant 0.000000e+00 : f32
    %48 = vector.broadcast %cst_21 : f32 to vector<4x256xf32>
    %49 = arith.select %47, %45, %48 : vector<4x256xi1>, vector<4x256xf32>
    %c0_22 = arith.constant 0 : index
    %c3 = arith.constant 3 : index
    %50 = vector.load %arg2[%c0_22, %c3] : memref<4x9xf32, #tpu.memory_space<vmem>>, vector<4x1xf32>
    %51 = vector.broadcast %50 : vector<4x1xf32> to vector<4x256xf32>
    %52 = arith.mulf %51, %49 : vector<4x256xf32>
    %53 = arith.addf %43, %52 : vector<4x256xf32>
    %c0_23 = arith.constant 0 : index
    %c0_24 = arith.constant 0 : index
    %c17 = arith.constant 17 : index
    %54 = vector.load %arg1[%c0_23, %c0_24, %c17] : memref<1x8x290xf32, #tpu.memory_space<vmem>>, vector<1x4x256xf32>
    %55 = vector.shape_cast %54 : vector<1x4x256xf32> to vector<4x256xf32>
    %c0_25 = arith.constant 0 : index
    %c4 = arith.constant 4 : index
    %56 = vector.load %arg2[%c0_25, %c4] : memref<4x9xf32, #tpu.memory_space<vmem>>, vector<4x1xf32>
    %57 = vector.broadcast %56 : vector<4x1xf32> to vector<4x256xf32>
    %58 = arith.mulf %57, %55 : vector<4x256xf32>
    %59 = arith.addf %53, %58 : vector<4x256xf32>
    %c0_26 = arith.constant 0 : index
    %c0_27 = arith.constant 0 : index
    %c18 = arith.constant 18 : index
    %60 = vector.load %arg1[%c0_26, %c0_27, %c18] : memref<1x8x290xf32, #tpu.memory_space<vmem>>, vector<1x4x256xf32>
    %61 = vector.shape_cast %60 : vector<1x4x256xf32> to vector<4x256xf32>
    %c14_i32_28 = arith.constant 14 : i32
    %62 = vector.broadcast %c14_i32_28 : i32 to vector<4x256xi32>
    %63 = arith.cmpi sle, %16, %62 : vector<4x256xi32>
    %cst_29 = arith.constant 0.000000e+00 : f32
    %64 = vector.broadcast %cst_29 : f32 to vector<4x256xf32>
    %65 = arith.select %63, %61, %64 : vector<4x256xi1>, vector<4x256xf32>
    %c0_30 = arith.constant 0 : index
    %c5 = arith.constant 5 : index
    %66 = vector.load %arg2[%c0_30, %c5] : memref<4x9xf32, #tpu.memory_space<vmem>>, vector<4x1xf32>
    %67 = vector.broadcast %66 : vector<4x1xf32> to vector<4x256xf32>
    %68 = arith.mulf %67, %65 : vector<4x256xf32>
    %69 = arith.addf %59, %68 : vector<4x256xf32>
    %c0_31 = arith.constant 0 : index
    %c0_32 = arith.constant 0 : index
    %c32 = arith.constant 32 : index
    %70 = vector.load %arg1[%c0_31, %c0_32, %c32] : memref<1x8x290xf32, #tpu.memory_space<vmem>>, vector<1x4x256xf32>
    %71 = vector.shape_cast %70 : vector<1x4x256xf32> to vector<4x256xf32>
    %c1_i32_33 = arith.constant 1 : i32
    %72 = vector.broadcast %c1_i32_33 : i32 to vector<4x256xi32>
    %73 = arith.cmpi sge, %16, %72 : vector<4x256xi32>
    %cst_34 = arith.constant 0.000000e+00 : f32
    %74 = vector.broadcast %cst_34 : f32 to vector<4x256xf32>
    %75 = arith.select %73, %71, %74 : vector<4x256xi1>, vector<4x256xf32>
    %c0_35 = arith.constant 0 : index
    %c6 = arith.constant 6 : index
    %76 = vector.load %arg2[%c0_35, %c6] : memref<4x9xf32, #tpu.memory_space<vmem>>, vector<4x1xf32>
    %77 = vector.broadcast %76 : vector<4x1xf32> to vector<4x256xf32>
    %78 = arith.mulf %77, %75 : vector<4x256xf32>
    %79 = arith.addf %69, %78 : vector<4x256xf32>
    %c0_36 = arith.constant 0 : index
    %c0_37 = arith.constant 0 : index
    %c33 = arith.constant 33 : index
    %80 = vector.load %arg1[%c0_36, %c0_37, %c33] : memref<1x8x290xf32, #tpu.memory_space<vmem>>, vector<1x4x256xf32>
    %81 = vector.shape_cast %80 : vector<1x4x256xf32> to vector<4x256xf32>
    %c0_38 = arith.constant 0 : index
    %c7 = arith.constant 7 : index
    %82 = vector.load %arg2[%c0_38, %c7] : memref<4x9xf32, #tpu.memory_space<vmem>>, vector<4x1xf32>
    %83 = vector.broadcast %82 : vector<4x1xf32> to vector<4x256xf32>
    %84 = arith.mulf %83, %81 : vector<4x256xf32>
    %85 = arith.addf %79, %84 : vector<4x256xf32>
    %c0_39 = arith.constant 0 : index
    %c0_40 = arith.constant 0 : index
    %c34 = arith.constant 34 : index
    %86 = vector.load %arg1[%c0_39, %c0_40, %c34] : memref<1x8x290xf32, #tpu.memory_space<vmem>>, vector<1x4x256xf32>
    %87 = vector.shape_cast %86 : vector<1x4x256xf32> to vector<4x256xf32>
    %c14_i32_41 = arith.constant 14 : i32
    %88 = vector.broadcast %c14_i32_41 : i32 to vector<4x256xi32>
    %89 = arith.cmpi sle, %16, %88 : vector<4x256xi32>
    %cst_42 = arith.constant 0.000000e+00 : f32
    %90 = vector.broadcast %cst_42 : f32 to vector<4x256xf32>
    %91 = arith.select %89, %87, %90 : vector<4x256xi1>, vector<4x256xf32>
    %c0_43 = arith.constant 0 : index
    %c8 = arith.constant 8 : index
    %92 = vector.load %arg2[%c0_43, %c8] : memref<4x9xf32, #tpu.memory_space<vmem>>, vector<4x1xf32>
    %93 = vector.broadcast %92 : vector<4x1xf32> to vector<4x256xf32>
    %94 = arith.mulf %93, %91 : vector<4x256xf32>
    %95 = arith.addf %85, %94 : vector<4x256xf32>
    %c0_44 = arith.constant 0 : index
    %c4_45 = arith.constant 4 : index
    %c17_46 = arith.constant 17 : index
    %96 = vector.load %arg1[%c0_44, %c4_45, %c17_46] : memref<1x8x290xf32, #tpu.memory_space<vmem>>, vector<1x4x256xf32>
    %97 = vector.shape_cast %96 : vector<1x4x256xf32> to vector<4x256xf32>
    %c0_47 = arith.constant 0 : index
    %c0_48 = arith.constant 0 : index
    %98 = vector.load %arg3[%c0_47, %c0_48] : memref<8x8xf32, #tpu.memory_space<vmem>>, vector<8x8xf32>
    %c0_49 = arith.constant 0 : index
    %c0_50 = arith.constant 0 : index
    %99 = vector.load %arg4[%c0_49, %c0_50] : memref<8x1xf32, #tpu.memory_space<vmem>>, vector<8x1xf32>
    %100 = vector.shape_cast %99 : vector<8x1xf32> to vector<8x1xf32>
    %101 = vector.broadcast %100 : vector<8x1xf32> to vector<8x256xf32>
    %102 = vector.extract_strided_slice %98 {offsets = [0, 0], sizes = [8, 1], strides = [1, 1]} : vector<8x8xf32> to vector<8x1xf32>
    %103 = vector.extract_strided_slice %95 {offsets = [0, 0], sizes = [1, 256], strides = [1, 1]} : vector<4x256xf32> to vector<1x256xf32>
    %104 = vector.shape_cast %103 : vector<1x256xf32> to vector<1x256xf32>
    %105 = vector.broadcast %104 : vector<1x256xf32> to vector<8x256xf32>
    %106 = vector.broadcast %102 : vector<8x1xf32> to vector<8x256xf32>
    %107 = arith.mulf %106, %105 : vector<8x256xf32>
    %108 = arith.addf %101, %107 : vector<8x256xf32>
    %109 = vector.extract_strided_slice %98 {offsets = [0, 1], sizes = [8, 1], strides = [1, 1]} : vector<8x8xf32> to vector<8x1xf32>
    %110 = vector.extract_strided_slice %95 {offsets = [1, 0], sizes = [1, 256], strides = [1, 1]} : vector<4x256xf32> to vector<1x256xf32>
    %111 = vector.shape_cast %110 : vector<1x256xf32> to vector<1x256xf32>
    %112 = vector.broadcast %111 : vector<1x256xf32> to vector<8x256xf32>
    %113 = vector.broadcast %109 : vector<8x1xf32> to vector<8x256xf32>
    %114 = arith.mulf %113, %112 : vector<8x256xf32>
    %115 = arith.addf %108, %114 : vector<8x256xf32>
    %116 = vector.extract_strided_slice %98 {offsets = [0, 2], sizes = [8, 1], strides = [1, 1]} : vector<8x8xf32> to vector<8x1xf32>
    %117 = vector.extract_strided_slice %95 {offsets = [2, 0], sizes = [1, 256], strides = [1, 1]} : vector<4x256xf32> to vector<1x256xf32>
    %118 = vector.shape_cast %117 : vector<1x256xf32> to vector<1x256xf32>
    %119 = vector.broadcast %118 : vector<1x256xf32> to vector<8x256xf32>
    %120 = vector.broadcast %116 : vector<8x1xf32> to vector<8x256xf32>
    %121 = arith.mulf %120, %119 : vector<8x256xf32>
    %122 = arith.addf %115, %121 : vector<8x256xf32>
    %123 = vector.extract_strided_slice %98 {offsets = [0, 3], sizes = [8, 1], strides = [1, 1]} : vector<8x8xf32> to vector<8x1xf32>
    %124 = vector.extract_strided_slice %95 {offsets = [3, 0], sizes = [1, 256], strides = [1, 1]} : vector<4x256xf32> to vector<1x256xf32>
    %125 = vector.shape_cast %124 : vector<1x256xf32> to vector<1x256xf32>
    %126 = vector.broadcast %125 : vector<1x256xf32> to vector<8x256xf32>
    %127 = vector.broadcast %123 : vector<8x1xf32> to vector<8x256xf32>
    %128 = arith.mulf %127, %126 : vector<8x256xf32>
    %129 = arith.addf %122, %128 : vector<8x256xf32>
    %130 = vector.extract_strided_slice %98 {offsets = [0, 4], sizes = [8, 1], strides = [1, 1]} : vector<8x8xf32> to vector<8x1xf32>
    %131 = vector.extract_strided_slice %97 {offsets = [0, 0], sizes = [1, 256], strides = [1, 1]} : vector<4x256xf32> to vector<1x256xf32>
    %132 = vector.shape_cast %131 : vector<1x256xf32> to vector<1x256xf32>
    %133 = vector.broadcast %132 : vector<1x256xf32> to vector<8x256xf32>
    %134 = vector.broadcast %130 : vector<8x1xf32> to vector<8x256xf32>
    %135 = arith.mulf %134, %133 : vector<8x256xf32>
    %136 = arith.addf %129, %135 : vector<8x256xf32>
    %137 = vector.extract_strided_slice %98 {offsets = [0, 5], sizes = [8, 1], strides = [1, 1]} : vector<8x8xf32> to vector<8x1xf32>
    %138 = vector.extract_strided_slice %97 {offsets = [1, 0], sizes = [1, 256], strides = [1, 1]} : vector<4x256xf32> to vector<1x256xf32>
    %139 = vector.shape_cast %138 : vector<1x256xf32> to vector<1x256xf32>
    %140 = vector.broadcast %139 : vector<1x256xf32> to vector<8x256xf32>
    %141 = vector.broadcast %137 : vector<8x1xf32> to vector<8x256xf32>
    %142 = arith.mulf %141, %140 : vector<8x256xf32>
    %143 = arith.addf %136, %142 : vector<8x256xf32>
    %144 = vector.extract_strided_slice %98 {offsets = [0, 6], sizes = [8, 1], strides = [1, 1]} : vector<8x8xf32> to vector<8x1xf32>
    %145 = vector.extract_strided_slice %97 {offsets = [2, 0], sizes = [1, 256], strides = [1, 1]} : vector<4x256xf32> to vector<1x256xf32>
    %146 = vector.shape_cast %145 : vector<1x256xf32> to vector<1x256xf32>
    %147 = vector.broadcast %146 : vector<1x256xf32> to vector<8x256xf32>
    %148 = vector.broadcast %144 : vector<8x1xf32> to vector<8x256xf32>
    %149 = arith.mulf %148, %147 : vector<8x256xf32>
    %150 = arith.addf %143, %149 : vector<8x256xf32>
    %151 = vector.extract_strided_slice %98 {offsets = [0, 7], sizes = [8, 1], strides = [1, 1]} : vector<8x8xf32> to vector<8x1xf32>
    %152 = vector.extract_strided_slice %97 {offsets = [3, 0], sizes = [1, 256], strides = [1, 1]} : vector<4x256xf32> to vector<1x256xf32>
    %153 = vector.shape_cast %152 : vector<1x256xf32> to vector<1x256xf32>
    %154 = vector.broadcast %153 : vector<1x256xf32> to vector<8x256xf32>
    %155 = vector.broadcast %151 : vector<8x1xf32> to vector<8x256xf32>
    %156 = arith.mulf %155, %154 : vector<8x256xf32>
    %157 = arith.addf %150, %156 : vector<8x256xf32>
    %c0_51 = arith.constant 0 : index
    %c0_52 = arith.constant 0 : index
    %c0_53 = arith.constant 0 : index
    %158 = vector.load %arg5[%c0_51, %c0_52, %c0_53] : memref<1x8x256xf32, #tpu.memory_space<vmem>>, vector<1x8x256xf32>
    %159 = vector.shape_cast %158 : vector<1x8x256xf32> to vector<8x256xf32>
    %160 = vector.shape_cast %157 : vector<8x256xf32> to vector<1x8x256xf32>
    tpu.vector_store %arg5[%c0_51, %c0_52, %c0_53], %160 {strides = array<i32>} : memref<1x8x256xf32, #tpu.memory_space<vmem>>, vector<1x8x256xf32>,
    return
  }
  func.func @transform_0(%arg0: i32) -> (i32, i32, i32) {
    %c0_i32 = arith.constant 0 : i32
    %c0_i32_0 = arith.constant 0 : i32
    %c0_i32_1 = arith.constant 0 : i32
    return %arg0, %c0_i32, %c0_i32_0 : i32, i32, i32
  }
  func.func @transform_1(%arg0: i32) -> (i32, i32) {
    %c0_i32 = arith.constant 0 : i32
    %c0_i32_0 = arith.constant 0 : i32
    %c0_i32_1 = arith.constant 0 : i32
    return %c0_i32, %c0_i32_0 : i32, i32
  }
  func.func @transform_2(%arg0: i32) -> (i32, i32) {
    %c0_i32 = arith.constant 0 : i32
    %c0_i32_0 = arith.constant 0 : i32
    %c0_i32_1 = arith.constant 0 : i32
    return %c0_i32, %c0_i32_0 : i32, i32
  }
  func.func @transform_3(%arg0: i32) -> (i32, i32) {
    %c0_i32 = arith.constant 0 : i32
    %c0_i32_0 = arith.constant 0 : i32
    %c0_i32_1 = arith.constant 0 : i32
    return %c0_i32, %c0_i32_0 : i32, i32
  }
  func.func @transform_4(%arg0: i32) -> (i32, i32, i32) {
    %c0_i32 = arith.constant 0 : i32
    %c0_i32_0 = arith.constant 0 : i32
    %c0_i32_1 = arith.constant 0 : i32
    return %arg0, %c0_i32, %c0_i32_0 : i32, i32, i32
  }
}

</mosaic_0001>

<bundles_post_ra>
// kernel: tpu_custom_call.1
= control target key start
LH: loop header
LB: loop body
LE: loop exit
PB: predicated region body
PF: predicated region fallthrough
CT: control target
= control target key end

     0   :  { %9 = vsyncpa [#allocation3], 0  ;;  %s1331_s0 = inlined_call_operand.hbm [shape: f32[2,8,290], index: 0, kind: input, shape index: {}]   ;;  %s1332_s1 = inlined_call_operand.vmem [shape: f32[4,9], index: 1, kind: input, shape index: {}]   ;;  %s1333_s2 = inlined_call_operand.vmem [shape: f32[8,8], index: 2, kind: input, shape index: {}]   ;;  %s1334_s3 = inlined_call_operand.vmem [shape: f32[8,1], index: 3, kind: input, shape index: {}]   ;;  %s1335_s4 = inlined_call_operand.hbm [shape: f32[2,8,256], index: 4, kind: output, shape index: {}]  }
   0x1   :  { %11 = vsyncpa [#allocation3 + $0x1], 0 }
   0x2   :  { %12 = vsyncpa [#allocation4], 0 }
   0x3   :  { %14 = vsyncpa [#allocation4 + $0x1], 0  ;;  %s975_s15 = smov 0   ;;  %s977_s16 = smov 0  }
   0x4   :  { %s979_s17 = smov 0   ;;  %s981_s18 = smov 0  }
   0x5 LB: > { %s996_s19 = sadd.s32 4294967295, %s929_s18   ;;  %s737_s20 = sadd.s32 4294967294, %s929_s18   ;;  %s929_s18 = sphi %s981_s18, %s1357_s18   ;;  %s925_s17 = sphi %s979_s17, %s1356_s17   ;;  %s921_s16 = sphi %s977_s16, %s1355_s16   ;;  %s917_s15 = sphi %s975_s15, %s1354_s15  }
   0x6   : > { %s1000_s21 = sadd.s32 1, %s929_s18   ;;  %s27_s22 = sadd.s32 1, %s925_s17 }
   0x7   : > { %s24_s23 = ssub.s32 %s929_s18, %s1000_s21  ;;  %p34_p0 = scmp.ne.s32.totalorder %s925_s17, %s921_s16 }
   0x8   : > { %p25_p1 = scmp.eq.s32.totalorder %s24_s23, 0  ;;  %p35_p2 = scmp.eq.s32.totalorder %s929_s18, 0 }
   0x9   : > { %p40_p3 = scmp.ne.s32.totalorder %s921_s16, %s917_s15  ;;  %p41_p4 = scmp.eq.s32.totalorder %s996_s19, 0 }
   0xa   : > { %s1012_s24 = scalar_select %p25_p1, %s925_s17, %s27_s22  }
   0xb   : > { %p36_p5 = por %p35_p2, %p34_p0  ;;  %p1014_p6 = por %p41_p4, %p40_p3 }
   0xc   : > { %p127_p7 = scmp.eq.s32.totalorder %s996_s19, 1  ;;  %p133_p8 = scmp.eq.s32.totalorder %s737_s20, 1 }
   0xd   : > { %p764_p10 = scmp.lt.s32.totalorder %s929_s18, 2  ;;  %s162_s28 = sand.u32 1, %s925_s17  }
   0xe   : > { %p1021_p11 = por %p127_p7, %p34_p0  ;;  %p1025_p12 = por %p133_p8, %p40_p3 }
   0xf   : > { %s750_s29 = smul.u32 384, %s929_s18  ;;  %p1036_p13 = pnand %p764_p10, %p36_p5 }
  0x10   : > { %s1338_s26 = scalar_select %p1021_p11, 1, 0 }
  0x11   : > { %s1339_s27 = scalar_select %p1025_p12, 1, 0 }
  0x12   : > { %s749_s30 = smul.u32 24, %s162_s28  ;;  %s1034_s7 = scalar_lea.hbm %s1331_s0, %s750_s29 }
  0x13   : > { %s163_s11 = scalar_lea.sflag [#allocation3], %s162_s28  ;;  %s833_s12 = scalar_lea.hbm %s1034_s7, 384 }
  0x14   : > { %s166_s9 = scalar_lea.vmem [#allocation2], %s749_s30  ;;  %p834_p2 = scmp.ne.s32.totalorder %s1034_s7, %s833_s12 }
  0x15   : > { %s174_s10 = sshll.u32 %s166_s9, 4  ;;  %p835_p3 = pneg %p1036_p13  ;;  %s1041_s10 = int_to_ptr.vmem [resolvable:$true] %s174_s10 }
  0x16   : > { %s838_s20 = scalar_lea.hbm %s1331_s0, 768  ;;  %p839_p7 = scmp.lt.u32.totalorder %s1034_s7, %s1331_s0 }
  0x17   : > { %p836_p4 = pnand %p835_p3, %p834_p2  ;;  %p840_p8 = scmp.lt.u32.totalorder %s838_s20, %s833_s12 }
  0x18   : > { %p842_p9 = scmp.lt.u32.totalorder %s833_s12, %s1034_s7 }
  0x19   : > { %p837_p5 = pneg %p836_p4  ;;  %p841_p10 = por %p840_p8, %p839_p7 }
  0x1b   : > { %p843_p0 = por %p842_p9, %p841_p10 }
  0x1d   : > { %p844_p1 = pnand %p843_p0, %p837_p5 }
  0x1f   : > { %847 = shalt.err (!%p844_p1)
}
  0x20   : > { %s848_s28 = scalar_lea.vmem %s1041_s10, 384  ;;  %s931_s29 = smov [#allocation2]  }
  0x21   : > { %p849_p2 = scmp.ne.s32.totalorder %s1041_s10, %s848_s28  ;;  %s853_s30 = sshll.u32 %s931_s29, 4  ;;  %s854_s30 = int_to_ptr.vmem [resolvable:$false] %s853_s30 }
  0x22   : > { %s855_s5 = scalar_lea.vmem %s854_s30, 768  ;;  %p856_p11 = scmp.lt.s32.totalorder %s1041_s10, %s854_s30 }
  0x23   : > { %p851_p4 = pnand %p849_p2, %p835_p3  ;;  %p857_p7 = scmp.lt.s32.totalorder %s855_s5, %s848_s28 }
  0x25   : > { %p852_p12 = pneg %p851_p4  ;;  %p858_p8 = por %p857_p7, %p856_p11 }
  0x27   : > { %p859_p9 = pnand %p858_p8, %p852_p12 }
  0x29   : > { %862 = shalt.err (!%p859_p9)
}
  0x2a   : > { %759 = dma.hbm_to_vmem [thread:$0]  (!%p1036_p13), %s1034_s7, 384, %s1041_s10, %s163_s11  }
  0x2b   : > { %p1341_p0 = scmp.lt.s32.totalorder %s929_s18, 3  ;;  %p1342_p1 = scmp.ge.s32.totalorder %s929_s18, 1 }
  0x2d   : > { %p180_p3 = pnand %p1342_p1, %p1341_p0 }
  0x2e   : > { %s1074_s6 = sand.u32 (!%p180_p3), 1, %s921_s16  }
  0x2f   : > { %183 = sbr.rel (%p180_p3) target bundleno = 372 (0x174), region = 36  ;;  %s186_s12 = scalar_lea.sflag (!%p180_p3), [#allocation3], %s1074_s6 }
  0x30   : > { %s751_s9 = smul.u32 (!%p180_p3), 24, %s1074_s6 }
  0x32   : > { %s1078_s13 = scalar_lea.vmem (!%p180_p3), [#allocation2], %s751_s9 }
  0x36   : > { %908 = dma.done.wait (%p1014_p6), %s186_s12, 384  }
  0x37   : > { %910 = vsyncadd (%p1014_p6), %s186_s12, 4294966912  ;;  %v932_v0 = vmov 1   ;;  %v933_v1 = vmov 7   ;;  %v247_v2 = vld [vmem:[%s1332_s1] sm:$0xf]  ;;  %v934_v4 = vmov 4   ;;  %v214_v16 = vlaneseq }
  0x38   : > { %815 = vset.pattern.permute.xlu0 %v932_v0  ;;  %817 = vset.pattern.permute.xlu1 %v933_v1  ;;  %v1092_v3 = vld [vmem:[%s1333_s2] sm:$0xff]  ;;  %v935_v5 = vmov 5   ;;  %v936_v6 = vmov 6   ;;  %s937_s25 = smov 126   ;;  %v938_v9 = vmov 8   ;;  %s939_s14 = smov 112  }
  0x39   : > { %261 = vperm.xlu0 %815, %v247_v2   ;;  %396 = vperm.xlu1 %817, %v247_v2   ;;  %v1098_v7 = vld [vmem:[%s1078_s13 + $0x8] sm:$0xf]  ;;  %v1103_v8 = vld [vmem:[%s1078_s13] sm:$0xf]  ;;  %v1108_v10 = vld [vmem:[%s1078_s13 + $0x10] sm:$0xf] }
  0x3a   : > { %v940_v11 = vmov 0   ;;  %v941_v12 = vmov 2   ;;  %s942_s20 = smov 110   ;;  %s943_s22 = smov 96   ;;  %v443_v13 = vld [vmem:[%s1334_s3] sm:$0xff]  ;;  %v945_v14 = vmov 3  }
  0x3b   : > { %s944_s23 = smov 94   ;;  %s946_s30 = smov 127   ;;  %v1132_v20 = vshrl.u32 %v214_v16, 7  ;;  %v1135_v23 = vand.u32 127, %v214_v16  ;;  %v439_v30 = vld [vmem:[%s1078_s13] sm:$0xf0] }
  0x3c   : > { %s947_s5 = smov 111   ;;  %v440_v36 = vld [vmem:[%s1078_s13 + $0x8] sm:$0xf0]  ;;  %s948_s9 = smov 95   ;;  %v241_v40 = vld [vmem:[%s1078_s13] sm:$0xf] }
  0x3d   : > { %816 = vset.pattern.permute.xlu0 %v934_v4  ;;  %818 = vset.pattern.permute.xlu1 %v934_v4  ;;  %v1140_v26 = vadd.s32 128, %v1135_v23  ;;  %v516_v28 = vsub.s32 4, %v1132_v20  ;;  %v221_v37 = vand.u32 15, %v1135_v23  ;;  %v242_v41 = vld [vmem:[%s1078_s13 + $0x8] sm:$0xf]  ;;  %v550_v45 = vsub.s32 5, %v1132_v20 }
  0x3e   : > { %331 = vperm.xlu0 %816, %v247_v2   ;;  %527 = vperm.xlu1 %818, %v1092_v3   ;;  %v441_v42 = vld [vmem:[%s1078_s13 + $0x10] sm:$0xf0]  ;;  %v584_v58 = vsub.s32 6, %v1132_v20  ;;  %vm294_vm2 = vcmask 1031168   ;;  %vm315_vm3 = vcmask 916480   ;;  %vm276_vm5 = vcmask 1039360  }
  0x3f   : > { %v228_v32 = vand.u32 15, %v1140_v26  ;;  %v517_v34 = vrot.slane %v439_v30, %v516_v28  ;;  %vm1155_vm0 = vcmp.ge.s32.totalorder %v221_v37, 1  ;;  %v521_v43 = vrot.slane %v440_v36, %v516_v28  ;;  %s742_s12 = sshll.u32 %s1074_s6, 4  ;;  %s748_s13 = sshll.u32 %s996_s19, 8 }
  0x40   : > { %v245_v48 = vsel %vm1155_vm0, %v241_v40, 0.0  ;;  %v525_v50 = vrot.slane %v441_v42, %v516_v28  ;;  %v551_v52 = vrot.slane %v439_v30, %v550_v45  ;;  %v555_v57 = vrot.slane %v440_v36, %v550_v45  ;;  %s213_s7 = scalar_lea.vmem [#allocation5], %s742_s12  ;;  %s653_s19 = scalar_lea.sflag [#allocation4], %s1074_s6 }
  0x41   : > { %vm1161_vm1 = vcmp.ge.s32.totalorder %v228_v32, 1  ;;  %v559_v59 = vrot.slane %v441_v42, %v550_v45  ;;  %v585_v62 = vrot.slane %v439_v30, %v584_v58  ;;  %v593_v4 = vrot.slane %v441_v42, %v584_v58  ;;  %s667_s8 = sshll.u32 %s213_s7, 4  ;;  %p1351_p11 = scmp.ne.s32.totalorder %s1338_s26, 0  ;;  %s1289_s8 = int_to_ptr.vmem [resolvable:$true] %s667_s8 }
  0x42   : > { %819 = vset.pattern.permute.xlu1 %v935_v5  ;;  %820 = vset.pattern.permute.xlu0 %v936_v6  ;;  %v246_v49 = vsel %vm1161_vm1, %v242_v41, 0.0  ;;  %vm1210_vm4 = vcmp.le.s32.totalorder %v221_v37, 14  ;;  %vm1219_vm6 = vcmp.le.s32.totalorder %v228_v32, 14  ;;  %vm359_vm7 = vcmask 900096  }
  0x43   : > { %561 = vperm.xlu1 %819, %v1092_v3   ;;  %595 = vperm.xlu0 %820, %v1092_v3   ;;  %vm380_vm8 = vcmask 785408   ;;  %vm346_vm9 = vcmask 908288   ;;  %vm424_vm10 = vcmask 769024   ;;  %vm411_vm11 = vcmask 777216  }
  0x47   : > { %290 = vrot.lane.b32.xlu0 %v1098_v7, %s937_s25  ;;  %821 = vset.pattern.permute.xlu1 %v933_v1 }
  0x48   : > { %629 = vperm.xlu1 %821, %v1092_v3   ;;  %826 = vset.pattern.permute.xlu0 %v938_v9 }
  0x4b   : > { %309 = vrot.lane.b32.xlu0 %v1103_v8, %s939_s14 }
  0x4c   : > { %822 = vset.pattern.permute.xlu1 %v940_v11 }
  0x4d   : > { %250 = vperm.xlu1 %822, %v247_v2  }
  0x4f   : > { %313 = vrot.lane.b32.xlu0 %v1108_v10, %s939_s14 }
  0x51   : > { %288 = vrot.lane.b32.xlu1 %v1103_v8, %s937_s25 }
  0x52   : > { %823 = vset.pattern.permute.xlu1 %v941_v12 }
  0x53   : > { %353 = vrot.lane.b32.xlu0 %v1103_v8, %s942_s20 }
  0x55   : > { %302 = vperm.xlu1 %823, %v247_v2  }
  0x57   : > { %357 = vrot.lane.b32.xlu0 %v1108_v10, %s942_s20 }
  0x59   : > { %292 = vrot.lane.b32.xlu1 %v1108_v10, %s937_s25  ;;  %s1287_s25 = scalar_lea.hbm %s1335_s4, %s748_s13 }
  0x5a   : > { %824 = vset.pattern.permute.xlu1 %v935_v5 }
  0x5b   : > { %432 = vperm.xlu0 %826, %v247_v2  }
  0x5d   : > { %367 = vperm.xlu1 %824, %v247_v2  }
  0x5f   : > { %378 = vrot.lane.b32.xlu0 %v1108_v10, %s943_s22 }
  0x60   : > { %828 = vset.pattern.permute.xlu0 %v940_v11 }
  0x61   : > { %311 = vrot.lane.b32.xlu1 %v1098_v7, %s939_s14  ;;  %s863_s14 = scalar_lea.vmem %s1289_s8, 256 }
  0x62   : > { %825 = vset.pattern.permute.xlu1 %v936_v6  ;;  %p864_p6 = scmp.ne.s32.totalorder %s1289_s8, %s863_s14 }
  0x63   : > { %420 = vrot.lane.b32.xlu0 %v1098_v7, %s944_s23 }
  0x64   : > { %p865_p12 = pnand %p864_p6, %p1351_p11 }
  0x65   : > { %388 = vperm.xlu1 %825, %v247_v2  }
  0x66   : > { %p866_p13 = pneg %p865_p12 }
  0x67   : > { %446 = vperm.xlu0 %828, %v443_v13  }
  0x69   : > { %355 = vrot.lane.b32.xlu1 %v1098_v7, %s942_s20  ;;  %s949_s20 = smov [#allocation5]  }
  0x6a   : > { %827 = vset.pattern.permute.xlu1 %v940_v11 }
  0x6b   : > { %829 = vset.pattern.permute.xlu0 %v945_v14 }
  0x6c   : > { %323 = vperm.xlu0 %829, %v247_v2   ;;  %v618_v2 = vsub.s32 7, %v1132_v20 }
  0x6d   : > { %374 = vrot.lane.b32.xlu1 %v1103_v8, %s943_s22 }
  0x6e   : > { %v623_v9 = vrot.slane %v440_v36, %v618_v2 }
  0x71   : > { %376 = vrot.lane.b32.xlu1 %v1098_v7, %s943_s22  ;;  %s867_s22 = sshll.u32 %s949_s20, 4  ;;  %s868_s22 = int_to_ptr.vmem [resolvable:$false] %s867_s22 }
  0x72   : > { %p870_p5 = scmp.lt.s32.totalorder %s1289_s8, %s868_s22 }
  0x75   : > { %418 = vrot.lane.b32.xlu1 %v1103_v8, %s944_s23 }
  0x79   : > { %422 = vrot.lane.b32.xlu1 %v1108_v10, %s944_s23  ;;  %s869_s23 = scalar_lea.vmem %s868_s22, 512 }
  0x7a   : > { %p871_p10 = scmp.lt.s32.totalorder %s869_s23, %s863_s14 }
  0x7c   : > { %p872_p2 = por %p871_p10, %p870_p5 }
  0x7d   : > { %459 = vperm.xlu1 %827, %v1092_v3  }
  0x7e   : > { %p873_p4 = pnand %p872_p2, %p866_p13 }
  0x81   : > { %830 = vset.pattern.permute.xlu1 %v932_v0  ;;  %v589_v0 = vrot.slane %v440_v36, %v584_v58 }
  0x82   : > { %475 = vperm.xlu1 %830, %v1092_v3  }
  0x86   : > { %831 = vset.pattern.permute.xlu1 %v941_v12 }
  0x87   : > { %491 = vperm.xlu1 %831, %v1092_v3  }
  0xb8   : > { %v262_v15 = vpop.permute.xlu0 %261  ;;  %v397_v19 = vpop.permute.xlu1 %396 }
  0xb9   : > { %v264_v17 = vmul.f32 %v262_v15, %v1103_v8  ;;  %v265_v18 = vmul.f32 %v262_v15, %v1098_v7  ;;  %v266_v21 = vmul.f32 %v262_v15, %v1108_v10  ;;  %v399_v31 = vmul.f32 %v397_v19, %v1103_v8 }
  0xba   : > { %v400_v33 = vmul.f32 %v397_v19, %v1098_v7  ;;  %v401_v47 = vmul.f32 %v397_v19, %v1108_v10 }
  0xbb   : > { %272 = vrot.lane.b32.xlu1 %v265_v18, %s946_s30  ;;  %270 = vrot.lane.b32.xlu0 %v264_v17, %s946_s30 }
  0xbd   : > { %v332_v22 = vpop.permute.xlu0 %331  ;;  %v528_v29 = vpop.permute.xlu1 %527 }
  0xbe   : > { %v334_v24 = vmul.f32 %v332_v22, %v1103_v8  ;;  %v335_v25 = vmul.f32 %v332_v22, %v1098_v7  ;;  %v336_v27 = vmul.f32 %v332_v22, %v1108_v10  ;;  %v530_v44 = vmul.f32 %v528_v29, %v517_v34 }
  0xbf   : > { %274 = vrot.lane.b32.xlu0 %v266_v21, %s946_s30  ;;  %v531_v51 = vmul.f32 %v528_v29, %v521_v43  ;;  %v532_v56 = vmul.f32 %v528_v29, %v525_v50  ;;  %v619_v7 = vrot.slane %v439_v30, %v618_v2  ;;  %v627_v10 = vrot.slane %v441_v42, %v618_v2 }
  0xc0   : > { %340 = vrot.lane.b32.xlu1 %v334_v24, %s947_s5 }
  0xc2   : > { %v562_v35 = vpop.permute.xlu1 %561 }
  0xc3   : > { %342 = vrot.lane.b32.xlu0 %v335_v25, %s947_s5  ;;  %v564_v60 = vmul.f32 %v562_v35, %v551_v52  ;;  %v565_v61 = vmul.f32 %v562_v35, %v555_v57  ;;  %v566_v63 = vmul.f32 %v562_v35, %v559_v59 }
  0xc4   : > { %344 = vrot.lane.b32.xlu1 %v336_v27, %s947_s5 }
  0xc7   : > { %405 = vrot.lane.b32.xlu0 %v399_v31, %s948_s9  ;;  %v630_v46 = vpop.permute.xlu1 %629 }
  0xc8   : > { %407 = vrot.lane.b32.xlu1 %v400_v33, %s948_s9  ;;  %v632_v11 = vmul.f32 %v630_v46, %v619_v7  ;;  %v633_v13 = vmul.f32 %v630_v46, %v623_v9 }
  0xcb   : > { %409 = vrot.lane.b32.xlu0 %v401_v47, %s948_s9 }
  0xcc   : > { %536 = vrot.lane.b32.xlu1 %v530_v44, %s947_s5  ;;  %v251_v53 = vpop.permute.xlu1 %250 }
  0xcd   : > { %v1175_v54 = vmul.f32 %v251_v53, %v245_v48  ;;  %v1177_v55 = vmul.f32 %v251_v53, %v246_v49 }
  0xcf   : > { %507 = vperm.xlu0 %829, %v1092_v3   ;;  %v596_v3 = vpop.permute.xlu0 %595 }
  0xd0   : > { %538 = vrot.lane.b32.xlu1 %v531_v51, %s947_s5  ;;  %v598_v5 = vmul.f32 %v596_v3, %v585_v62  ;;  %v599_v6 = vmul.f32 %v596_v3, %v589_v0  ;;  %v600_v8 = vmul.f32 %v596_v3, %v593_v4  ;;  %v289_v12 = vpop.permute.xlu1 %288 }
  0xd3   : > { %540 = vrot.lane.b32.xlu0 %v532_v56, %s947_s5  ;;  %v291_v17 = vpop.permute.xlu0 %290 }
  0xd4   : > { %570 = vrot.lane.b32.xlu1 %v564_v60, %s947_s5  ;;  %832 = vset.pattern.permute.xlu0 %v933_v1  ;;  %v634_v1 = vmul.f32 %v630_v46, %v627_v10  ;;  %v303_v14 = vpop.permute.xlu1 %302  ;;  %v295_v43 = vsel %vm294_vm2, %v289_v12, %v291_v17 }
  0xd5   : > { %v299_v47 = vsel %vm1210_vm4, %v295_v43, 0.0 }
  0xd6   : > { %v305_v52 = vmul.f32 %v303_v14, %v299_v47 }
  0xd7   : > { %572 = vrot.lane.b32.xlu0 %v565_v61, %s947_s5  ;;  %v310_v19 = vpop.permute.xlu0 %309 }
  0xd8   : > { %574 = vrot.lane.b32.xlu1 %v566_v63, %s947_s5  ;;  %v293_v15 = vpop.permute.xlu1 %292 }
  0xd9   : > { %v296_v49 = vsel %vm294_vm2, %v291_v17, %v293_v15 }
  0xda   : > { %v300_v53 = vsel %vm1219_vm6, %v296_v49, 0.0 }
  0xdb   : > { %604 = vrot.lane.b32.xlu0 %v598_v5, %s947_s5  ;;  %v314_v22 = vpop.permute.xlu0 %313  ;;  %v306_v60 = vmul.f32 %v303_v14, %v300_v53  ;;  %v468_v53 = vsub.s32 1, %v1132_v20 }
  0xdc   : > { %606 = vrot.lane.b32.xlu1 %v599_v6, %s947_s5  ;;  %v1194_v16 = vpop.permute.xlu1 %367 }
  0xdf   : > { %608 = vrot.lane.b32.xlu0 %v600_v8, %s947_s5  ;;  %v354_v25 = vpop.permute.xlu0 %353 }
  0xe0   : > { %638 = vrot.lane.b32.xlu1 %v632_v11, %s947_s5  ;;  %v312_v18 = vpop.permute.xlu1 %311 }
  0xe1   : > { %v316_v46 = vsel %vm315_vm3, %v310_v19, %v312_v18  ;;  %v317_v56 = vsel %vm315_vm3, %v312_v18, %v314_v22 }
  0xe2   : > { %v320_v50 = vsel %vm1155_vm0, %v316_v46, 0.0  ;;  %v321_v61 = vsel %vm1161_vm1, %v317_v56, 0.0 }
  0xe3   : > { %640 = vrot.lane.b32.xlu0 %v633_v13, %s947_s5  ;;  %v358_v28 = vpop.permute.xlu0 %357 }
  0xe4   : > { %642 = vrot.lane.b32.xlu1 %v634_v1, %s947_s5  ;;  %v1196_v21 = vpop.permute.xlu1 %388 }
  0xe7   : > { %v1198_v30 = vpop.permute.xlu0 %432 }
  0xe8   : > { %v356_v24 = vpop.permute.xlu1 %355 }
  0xe9   : > { %v360_v32 = vsel %vm359_vm7, %v354_v25, %v356_v24  ;;  %v361_v62 = vsel %vm359_vm7, %v356_v24, %v358_v28 }
  0xea   : > { %v364_v2 = vsel %vm1210_vm4, %v360_v32, 0.0  ;;  %v365_v6 = vsel %vm1219_vm6, %v361_v62, 0.0  ;;  %v484_v32 = vsub.s32 2, %v1132_v20 }
  0xeb   : > { %v379_v33 = vpop.permute.xlu0 %378  ;;  %v370_v10 = vmul.f32 %v1194_v16, %v364_v2  ;;  %v371_v17 = vmul.f32 %v1194_v16, %v365_v6 }
  0xec   : > { %v375_v27 = vpop.permute.xlu1 %374 }
  0xef   : > { %v421_v36 = vpop.permute.xlu0 %420 }
  0xf0   : > { %v377_v29 = vpop.permute.xlu1 %376 }
  0xf1   : > { %v382_v7 = vsel %vm380_vm8, %v377_v29, %v379_v33 }
  0xf2   : > { %v386_v18 = vsel %vm1161_vm1, %v382_v7, 0.0 }
  0xf3   : > { %v1204_v41 = vpop.permute.xlu0 %446 }
  0xf4   : > { %v419_v31 = vpop.permute.xlu1 %418 }
  0xf7   : > { %v324_v45 = vpop.permute.xlu0 %323 }
  0xf8   : > { %v423_v34 = vpop.permute.xlu1 %422  ;;  %v326_v57 = vmul.f32 %v324_v45, %v320_v50  ;;  %v327_v5 = vmul.f32 %v324_v45, %v321_v61 }
  0xf9   : > { %v426_v38 = vsel %vm424_vm10, %v421_v36, %v423_v34 }
  0xfa   : > { %v430_v39 = vsel %vm1219_vm6, %v426_v38, 0.0 }
  0xfb   : > { %v436_v44 = vmul.f32 %v1198_v30, %v430_v39 }
  0xfc   : > { %v1200_v35 = vpop.permute.xlu1 %459 }
 0x101   : > { %v1202_v40 = vpop.permute.xlu1 %475 }
 0x106   : > { %v1206_v42 = vpop.permute.xlu1 %491 }
 0x12d   : > { %v273_v23 = vpop.permute.xlu1 %272  ;;  %v271_v37 = vpop.permute.xlu0 %270 }
 0x12e   : > { %v277_v51 = vsel %vm276_vm5, %v271_v37, %v273_v23  ;;  %v451_v37 = vsub.s32 0, %v1132_v20 }
 0x12f   : > { %v281_v26 = vadd.f32 %v277_v51, %v1175_v54  ;;  %v381_v54 = vsel %vm380_vm8, %v375_v27, %v377_v29  ;;  %v392_v29 = vmul.f32 %v1196_v21, %v386_v18 }
 0x130   : > { %v385_v11 = vsel %vm1155_vm0, %v381_v54, 0.0 }
 0x131   : > { %v307_v58 = vadd.f32 %v305_v52, %v281_v26  ;;  %v275_v59 = vpop.permute.xlu0 %274  ;;  %v391_v19 = vmul.f32 %v1196_v21, %v385_v11 }
 0x132   : > { %v278_v63 = vsel %vm276_vm5, %v273_v23, %v275_v59  ;;  %v341_v0 = vpop.permute.xlu1 %340  ;;  %v500_v59 = vsub.s32 3, %v1132_v20 }
 0x133   : > { %v282_v3 = vadd.f32 %v278_v63, %v1177_v55  ;;  %v328_v4 = vadd.f32 %v326_v57, %v307_v58  ;;  %v425_v55 = vsel %vm424_vm10, %v419_v31, %v421_v36 }
 0x134   : > { %v429_v27 = vsel %vm1210_vm4, %v425_v55, 0.0 }
 0x135   : > { %v308_v8 = vadd.f32 %v306_v60, %v282_v3  ;;  %v343_v9 = vpop.permute.xlu0 %342  ;;  %v435_v43 = vmul.f32 %v1198_v30, %v429_v27 }
 0x136   : > { %v347_v12 = vsel %vm346_vm9, %v341_v0, %v343_v9  ;;  %v345_v13 = vpop.permute.xlu1 %344 }
 0x137   : > { %v351_v1 = vadd.f32 %v347_v12, %v328_v4  ;;  %v329_v14 = vadd.f32 %v327_v5, %v308_v8  ;;  %v348_v15 = vsel %vm346_vm9, %v343_v9, %v345_v13 }
 0x139   : > { %v372_v22 = vadd.f32 %v370_v10, %v351_v1  ;;  %v352_v24 = vadd.f32 %v348_v15, %v329_v14  ;;  %v406_v25 = vpop.permute.xlu0 %405 }
 0x13a   : > { %v408_v28 = vpop.permute.xlu1 %407 }
 0x13b   : > { %v373_v31 = vadd.f32 %v371_v17, %v352_v24  ;;  %v393_v33 = vadd.f32 %v391_v19, %v372_v22  ;;  %v412_v16 = vsel %vm411_vm11, %v406_v25, %v408_v28 }
 0x13d   : > { %v416_v45 = vadd.f32 %v412_v16, %v393_v33  ;;  %v410_v34 = vpop.permute.xlu0 %409  ;;  %v394_v36 = vadd.f32 %v392_v29, %v373_v31 }
 0x13e   : > { %v413_v46 = vsel %vm411_vm11, %v408_v28, %v410_v34  ;;  %v537_v47 = vpop.permute.xlu1 %536 }
 0x13f   : > { %v437_v49 = vadd.f32 %v435_v43, %v416_v45  ;;  %v417_v23 = vadd.f32 %v413_v46, %v394_v36 }
 0x141   : > { %v438_v21 = vadd.f32 %v436_v44, %v417_v23  ;;  %v452_v51 = vrot.slane %v437_v49, %v451_v37  ;;  %v469_v58 = vrot.slane %v437_v49, %v468_v53  ;;  %v485_v2 = vrot.slane %v437_v49, %v484_v32 }
 0x142   : > { %v539_v50 = vpop.permute.xlu1 %538  ;;  %v501_v5 = vrot.slane %v437_v49, %v500_v59 }
 0x143   : > { %v456_v52 = vrot.slane %v438_v21, %v451_v37  ;;  %v462_v56 = vmul.f32 %v1200_v35, %v452_v51  ;;  %v473_v30 = vrot.slane %v438_v21, %v468_v53  ;;  %v478_v63 = vmul.f32 %v1202_v40, %v469_v58 }
 0x144   : > { %v489_v54 = vrot.slane %v438_v21, %v484_v32  ;;  %v505_v6 = vrot.slane %v438_v21, %v500_v59  ;;  %v494_v7 = vmul.f32 %v1206_v42, %v485_v2  ;;  %v542_v15 = vsel %vm346_vm9, %v537_v47, %v539_v50 }
 0x145   : > { %v463_v26 = vmul.f32 %v1200_v35, %v456_v52  ;;  %v464_v60 = vadd.f32 %v462_v56, %v1204_v41  ;;  %v479_v0 = vmul.f32 %v1202_v40, %v473_v30 }
 0x146   : > { %v571_v48 = vpop.permute.xlu1 %570  ;;  %v495_v20 = vmul.f32 %v1206_v42, %v489_v54 }
 0x147   : > { %v465_v61 = vadd.f32 %v463_v26, %v1204_v41  ;;  %v480_v35 = vadd.f32 %v478_v63, %v464_v60 }
 0x149   : > { %v481_v4 = vadd.f32 %v479_v0, %v465_v61  ;;  %v496_v11 = vadd.f32 %v494_v7, %v480_v35 }
 0x14a   : > { %v575_v62 = vpop.permute.xlu1 %574 }
 0x14b   : > { %v497_v12 = vadd.f32 %v495_v20, %v481_v4 }
 0x14e   : > { %v508_v57 = vpop.permute.xlu0 %507  ;;  %v607_v41 = vpop.permute.xlu1 %606 }
 0x14f   : > { %v510_v8 = vmul.f32 %v508_v57, %v501_v5  ;;  %v511_v9 = vmul.f32 %v508_v57, %v505_v6 }
 0x151   : > { %v512_v13 = vadd.f32 %v510_v8, %v496_v11  ;;  %v513_v40 = vadd.f32 %v511_v9, %v497_v12 }
 0x152   : > { %v541_v3 = vpop.permute.xlu0 %540  ;;  %v639_v14 = vpop.permute.xlu1 %638 }
 0x153   : > { %v543_v1 = vsel %vm346_vm9, %v539_v50, %v541_v3  ;;  %v546_v19 = vadd.f32 %v542_v15, %v512_v13 }
 0x154   : > { %v547_v18 = vadd.f32 %v543_v1, %v513_v40 }
 0x156   : > { %v573_v10 = vpop.permute.xlu0 %572  ;;  %v643_v29 = vpop.permute.xlu1 %642 }
 0x157   : > { %v576_v17 = vsel %vm346_vm9, %v571_v48, %v573_v10  ;;  %v577_v42 = vsel %vm346_vm9, %v573_v10, %v575_v62 }
 0x158   : > { %v580_v25 = vadd.f32 %v576_v17, %v546_v19  ;;  %v581_v27 = vadd.f32 %v577_v42, %v547_v18 }
 0x15a   : > { %v605_v55 = vpop.permute.xlu0 %604 }
 0x15b   : > { %v610_v22 = vsel %vm346_vm9, %v605_v55, %v607_v41 }
 0x15c   : > { %v614_v28 = vadd.f32 %v610_v22, %v580_v25 }
 0x15e   : > { %v609_v38 = vpop.permute.xlu0 %608 }
 0x15f   : > { %v611_v24 = vsel %vm346_vm9, %v607_v41, %v609_v38 }
 0x160   : > { %v615_v31 = vadd.f32 %v611_v24, %v581_v27 }
 0x162   : > { %v641_v33 = vpop.permute.xlu0 %640 }
 0x163   : > { %v644_v16 = vsel %vm346_vm9, %v639_v14, %v641_v33  ;;  %v645_v39 = vsel %vm346_vm9, %v641_v33, %v643_v29 }
 0x164   : > { %v648_v43 = vadd.f32 %v644_v16, %v614_v28  ;;  %v649_v45 = vadd.f32 %v645_v39, %v615_v31 }
 0x166   : > { %650 = vst [vmem:[%s213_s7] sm:$0xff] %v648_v43  ;;  %651 = vst [vmem:[%s213_s7 + $0x8] sm:$0xff] %v649_v45 }
 0x167   : > { %876 = shalt.err (!%p873_p4)
}
 0x168   : > { %s877_s6 = scalar_lea.hbm %s1287_s25, 256  ;;  %s881_s30 = scalar_lea.hbm %s1335_s4, 512 }
 0x169   : > { %p878_p7 = scmp.ne.s32.totalorder %s1287_s25, %s877_s6  ;;  %p882_p0 = scmp.lt.u32.totalorder %s1287_s25, %s1335_s4 }
 0x16a   : > { %p883_p1 = scmp.lt.u32.totalorder %s881_s30, %s877_s6  ;;  %p885_p6 = scmp.lt.u32.totalorder %s877_s6, %s1287_s25 }
 0x16b   : > { %p879_p8 = pnand %p878_p7, %p1351_p11 }
 0x16c   : > { %p884_p3 = por %p883_p1, %p882_p0 }
 0x16d   : > { %p880_p9 = pneg %p879_p8 }
 0x16e   : > { %p886_p12 = por %p885_p6, %p884_p3 }
 0x170   : > { %p887_p13 = pnand %p886_p12, %p880_p9 }
 0x172   : > { %890 = shalt.err (!%p887_p13)
}
 0x173   : > { %754 = dma.vmem_to_hbm [thread:$0]  (%p1351_p11), %s1289_s8, 256, %s1287_s25, %s653_s19  }
 0x174 PF: > { %s679_s12 = sand.u32 1, %s917_s15   ;;  %p1352_p5 = scmp.ne.s32.totalorder %s1339_s27, 0 }
 0x175   : > { %p1353_p10 = scmp.ge.s32.totalorder %s929_s18, 2  ;;  %s680_s13 = scalar_lea.sflag [#allocation4], %s679_s12 }
 0x177   : > { %p761_p2 = pnand %p1353_p10, %p1352_p5 }
 0x179   : > { %912 = dma.done.wait (!%p761_p2), %s680_s13, 256  }
 0x17a   : > { %914 = vsyncadd (!%p761_p2), %s680_s13, 4294967040  ;;  %p17_p4 = scmp.ge.s32.totalorder %s1000_s21, 4   ;;  %s1354_s15 = smov %s921_s16 }
 0x17b   : > { %s1355_s16 = smov %s925_s17  ;;  %s1356_s17 = smov %s1012_s24 }
 0x17c   : > { %s1357_s18 = smov %s1000_s21  ;;  %19 = sbr.rel (!%p17_p4) target bundleno = 5 (0x5), region = 81 }
 0x183   :  { %685 = vsyncpa [#allocation3], 1 }
 0x184   :  { %687 = vsyncpa [#allocation3 + $0x1], 1 }
 0x185   :  { %688 = vsyncpa [#allocation4], 1 }
 0x186   :  { %690 = vsyncpa [#allocation4 + $0x1], 1 }

</bundles_post_ra>
